<compile_context>
chip_gen: v7x
topology: tpu7x:2x2x1
jax: 0.10.0
libtpu: 0.0.40
codegen_flags: <defaults>
</compile_context>

<pallas_src>
import functools

import jax
import jax.numpy as jnp
from jax.experimental import pallas as pl
from jax.experimental.pallas import tpu as pltpu


# -----------------------------------------------------------------------------
# Kernel
# -----------------------------------------------------------------------------
def _mlp_kernel(num_layers, *refs):
    """refs = (x_ref,
               w_in, b_in,
               [w_i, b_i] * num_layers,
               w_head, b_head,          # fused fc_out1 || fc_out2
               w_out, b_out,            # fused block-diagonal out1/out2 (padded cols)
               out_ref)"""
    x_ref = refs[0]
    out_ref = refs[-1]
    p = refs[1:-1]

    def linear(h, w_ref, b_ref):
        # bf16 (or f32) operands on the MXU, f32 accumulation, f32 bias add.
        y = jnp.dot(h.astype(w_ref.dtype), w_ref[...],
                    preferred_element_type=jnp.float32)
        return y + b_ref[...]

    def linear_relu(h, w_ref, b_ref):
        return jnp.maximum(linear(h, w_ref, b_ref), 0.0)

    idx = 0
    # fc_in + ReLU (+ Dropout(p=0) identity)
    h = linear_relu(x_ref[...], p[idx], p[idx + 1])
    idx += 2

    # num_layers x fc_block: Linear + ReLU (+ Dropout(p=0) identity)
    for _ in range(num_layers):
        h = linear_relu(h, p[idx], p[idx + 1])
        idx += 2

    # fused heads: relu(h @ [w1|w2] + [b1|b2]) then block-diag output matmul
    h = linear_relu(h, p[idx], p[idx + 1])
    idx += 2
    y = linear(h, p[idx], p[idx + 1])          # (tm, out_cols_padded) = [y1|y2|0...]

    # single lane-dense full-tile store
    out_ref[...] = y.astype(out_ref.dtype)


# -----------------------------------------------------------------------------
# Parameter packing (head fusion, dtype cast, output-column padding)
# -----------------------------------------------------------------------------
def pack_params(params, *, num_layers, output_size, mxu_dtype=jnp.bfloat16):
    """params layout: [w_in,b_in, (w,b)*num_layers, w_h1,b_h1, w_h2,b_h2,
                       ow1,ob1, ow2,ob2] with weights (in, out), biases (1, out)."""
    idx = 0

    def take():
        nonlocal idx
        w, b = params[idx], params[idx + 1]
        idx += 2
        return w, b

    packed = []
    w_in, b_in = take()
    packed += [w_in.astype(mxu_dtype), b_in.astype(jnp.float32)]
    for _ in range(num_layers):
        w, b = take()
        packed += [w.astype(mxu_dtype), b.astype(jnp.float32)]

    w1, b1 = take()
    w2, b2 = take()
    ow1, ob1 = take()
    ow2, ob2 = take()

    half_o = output_size // 2
    hh = w1.shape[1]                       # hidden_size // 2

    # Fused head: (H, 2*half_h)
    w_head = jnp.concatenate([w1, w2], axis=1)
    b_head = jnp.concatenate([b1, b2], axis=1)

    # Fused block-diagonal output: (2*half_h, 2*half_o), zero cross-blocks.
    w_out = jnp.zeros((2 * hh, 2 * half_o), jnp.float32)
    w_out = w_out.at[:hh, :half_o].set(ow1.astype(jnp.float32))
    w_out = w_out.at[hh:, half_o:].set(ow2.astype(jnp.float32))
    b_out = jnp.concatenate([ob1, ob2], axis=1)

    # Pad output columns to a multiple of 128 lanes (lane-dense store).
    out_cols = 2 * half_o
    out_cols_padded = max(128, ((out_cols + 127) // 128) * 128)
    pad = out_cols_padded - out_cols
    if pad:
        w_out = jnp.pad(w_out, ((0, 0), (0, pad)))
        b_out = jnp.pad(b_out, ((0, 0), (0, pad)))

    packed += [w_head.astype(mxu_dtype), b_head.astype(jnp.float32),
               w_out.astype(mxu_dtype), b_out.astype(jnp.float32)]
    return packed, out_cols, out_cols_padded


# -----------------------------------------------------------------------------
# Wrapper
# -----------------------------------------------------------------------------
def mlpv2_forward(x, params, *, input_size, hidden_size, num_layers, output_size,
                  tm=256, mxu_dtype=jnp.bfloat16):
    """x: any shape reshapable to (-1, input_size); params: flat list (see pack_params)."""
    x2d = x.reshape(-1, input_size).astype(jnp.float32)
    batch = x2d.shape[0]
    half_h = hidden_size // 2

    packed, out_cols, out_cols_padded = pack_params(
        params, num_layers=num_layers, output_size=output_size, mxu_dtype=mxu_dtype)

    # Batch tile: multiple of 8 sublanes (f32 input tile), capped at padded batch.
    tm = max(8, min(tm, ((batch + 7) // 8) * 8))
    n_tiles = pl.cdiv(batch, tm)
    batch_padded = n_tiles * tm
    if batch_padded != batch:
        x2d = jnp.pad(x2d, ((0, batch_padded - batch), (0, 0)))

    # Specs: x/out tiled over the batch grid; params get constant index_maps so
    # they stay VMEM-resident across grid steps.
    def const_spec(a):
        return pl.BlockSpec(a.shape, lambda i: (0,) * a.ndim)

    in_specs = [pl.BlockSpec((tm, input_size), lambda i: (i, 0))]
    in_specs += [const_spec(p) for p in packed]
    out_specs = pl.BlockSpec((tm, out_cols_padded), lambda i: (i, 0))

    # Advisory cost estimate for the XLA scheduler.
    flops_per_row = 2 * (input_size * hidden_size
                         + num_layers * hidden_size * hidden_size
                         + hidden_size * 2 * half_h
                         + 2 * half_h * out_cols_padded)
    param_bytes = int(sum(int(p.size) * p.dtype.itemsize for p in packed))
    bytes_accessed = int(x2d.size) * 4 + param_bytes + batch_padded * out_cols_padded * 4
    cost = pl.CostEstimate(flops=int(batch_padded * flops_per_row),
                           transcendentals=0,
                           bytes_accessed=int(bytes_accessed))

    # Explicit VMEM budget: resident params + double-buffered x/out tiles +
    # activation headroom; clamp so it also fits v7x's 64 MiB physical VMEM.
    est = (param_bytes
           + 2 * tm * input_size * 4
           + 2 * tm * out_cols_padded * 4
           + 8 * tm * max(hidden_size, 2 * half_h, out_cols_padded) * 4)
    vmem_limit = int(min(max(2 * est, 32 << 20), 48 << 20))

    kernel = functools.partial(_mlp_kernel, num_layers)
    out = pl.pallas_call(
        kernel,
        out_shape=jax.ShapeDtypeStruct((batch_padded, out_cols_padded), jnp.float32),
        grid=(n_tiles,),
        in_specs=in_specs,
        out_specs=out_specs,
        compiler_params=pltpu.CompilerParams(
            dimension_semantics=("parallel",),   # megacore-shardable on v7x
            vmem_limit_bytes=vmem_limit),
        cost_estimate=cost,
    )(x2d, *packed)

    return out[:batch, :out_cols]


# -----------------------------------------------------------------------------
# Deterministic parameter init (shapes follow MLPv2.__init__)
# -----------------------------------------------------------------------------
def init_params(key, input_size, hidden_size, output_size, num_layers):
    half_h = hidden_size // 2
    half_o = output_size // 2

    def linear_params(k, fan_in, fan_out):
        kw, kb = jax.random.split(k)
        scale = 1.0 / jnp.sqrt(fan_in)
        w = jax.random.uniform(kw, (fan_in, fan_out), jnp.float32, -scale, scale)
        b = jax.random.uniform(kb, (1, fan_out), jnp.float32, -scale, scale)
        return w, b

    keys = jax.random.split(key, 1 + num_layers + 4)
    params = []
    params += linear_params(keys[0], input_size, hidden_size)            # fc_in
    for i in range(num_layers):                                          # fc blocks
        params += linear_params(keys[1 + i], hidden_size, hidden_size)
    params += linear_params(keys[1 + num_layers + 0], hidden_size, half_h)  # fc_out1
    params += linear_params(keys[1 + num_layers + 1], hidden_size, half_h)  # fc_out2
    params += linear_params(keys[1 + num_layers + 2], half_h, half_o)       # out1
    params += linear_params(keys[1 + num_layers + 3], half_h, half_o)       # out2
    return params


# -----------------------------------------------------------------------------
# Pure-JAX reference (mxu_dtype lets us emulate the kernel's bf16 matmul inputs)
# -----------------------------------------------------------------------------
def reference_forward(x, params, *, input_size, num_layers, mxu_dtype=jnp.float32):
    x = x.reshape(-1, input_size).astype(jnp.float32)

    def lin(h, i):
        return jnp.dot(h.astype(mxu_dtype), params[i].astype(mxu_dtype),
                       preferred_element_type=jnp.float32) + params[i + 1]

    idx = 0
    h = jnp.maximum(lin(x, idx), 0.0)
    idx += 2
    for _ in range(num_layers):
        h = jnp.maximum(lin(h, idx), 0.0)
        idx += 2
    h1 = jnp.maximum(lin(h, idx), 0.0)
    h2 = jnp.maximum(lin(h, idx + 2), 0.0)
    y1 = lin(h1, idx + 4)
    y2 = lin(h2, idx + 6)
    return jnp.concatenate([y1, y2], axis=1)


# -----------------------------------------------------------------------------
if __name__ == "__main__":
    # Small config consistent with the module (output_size even so the two
    # output_size // 2 heads are non-degenerate).
    input_size, hidden_size, output_size, num_layers = 3, 32, 2, 5
    batch = 8

    key = jax.random.PRNGKey(0)
    kx, kp = jax.random.split(key)
    x = jax.random.normal(kx, (batch, input_size), jnp.float32)
    params = init_params(kp, input_size, hidden_size, output_size, num_layers)

    out = mlpv2_forward(
        x, params,
        input_size=input_size, hidden_size=hidden_size,
        num_layers=num_layers, output_size=output_size,
    )
    out = jax.block_until_ready(out)

    assert out.shape == (batch, 2 * (output_size // 2)), out.shape

    # Tight check vs. a reference that mirrors the kernel arithmetic
    # (bf16 matmul operands, f32 accumulation).
    ref_bf16 = reference_forward(x, params, input_size=input_size,
                                 num_layers=num_layers, mxu_dtype=jnp.bfloat16)
    assert jnp.allclose(out, ref_bf16, atol=1e-3, rtol=1e-3), (out, ref_bf16)

    # Loose check vs. the full-f32 reference (bf16 operand rounding).
    ref_f32 = reference_forward(x, params, input_size=input_size,
                                num_layers=num_layers, mxu_dtype=jnp.float32)
    assert jnp.allclose(out, ref_f32, atol=5e-2, rtol=5e-2), (out, ref_f32)

    print("KERNEL_OK")
</pallas_src>

<mosaic_0001>
module attributes {stable_mosaic.version = 11 : i64} {
  func.func @_mlp_kernel(%arg0: i32, %arg1: memref<8x3xf32, #tpu.memory_space<vmem>>, %arg2: memref<3x32xbf16, #tpu.memory_space<vmem>>, %arg3: memref<1x32xf32, #tpu.memory_space<vmem>>, %arg4: memref<32x32xbf16, #tpu.memory_space<vmem>>, %arg5: memref<1x32xf32, #tpu.memory_space<vmem>>, %arg6: memref<32x32xbf16, #tpu.memory_space<vmem>>, %arg7: memref<1x32xf32, #tpu.memory_space<vmem>>, %arg8: memref<32x32xbf16, #tpu.memory_space<vmem>>, %arg9: memref<1x32xf32, #tpu.memory_space<vmem>>, %arg10: memref<32x32xbf16, #tpu.memory_space<vmem>>, %arg11: memref<1x32xf32, #tpu.memory_space<vmem>>, %arg12: memref<32x32xbf16, #tpu.memory_space<vmem>>, %arg13: memref<1x32xf32, #tpu.memory_space<vmem>>, %arg14: memref<32x32xbf16, #tpu.memory_space<vmem>>, %arg15: memref<1x32xf32, #tpu.memory_space<vmem>>, %arg16: memref<32x128xbf16, #tpu.memory_space<vmem>>, %arg17: memref<1x128xf32, #tpu.memory_space<vmem>>, %arg18: memref<8x128xf32, #tpu.memory_space<vmem>>) attributes {dimension_semantics = [#tpu.dimension_semantics<parallel>], iteration_bounds = array<i64: 1>, scalar_prefetch = 0 : i64, scratch_operands = 0 : i64, tpu.core_type = #tpu.core_type<tc>, window_params = [{transform_indices = @transform_0, window_bounds = array<i64: 8, 3>}, {pipeline_mode = #tpu.pipeline_mode<synchronous>, transform_indices = @transform_1, window_bounds = array<i64: 3, 32>}, {pipeline_mode = #tpu.pipeline_mode<synchronous>, transform_indices = @transform_2, window_bounds = array<i64: 1, 32>}, {pipeline_mode = #tpu.pipeline_mode<synchronous>, transform_indices = @transform_3, window_bounds = array<i64: 32, 32>}, {pipeline_mode = #tpu.pipeline_mode<synchronous>, transform_indices = @transform_4, window_bounds = array<i64: 1, 32>}, {pipeline_mode = #tpu.pipeline_mode<synchronous>, transform_indices = @transform_5, window_bounds = array<i64: 32, 32>}, {pipeline_mode = #tpu.pipeline_mode<synchronous>, transform_indices = @transform_6, window_bounds = array<i64: 1, 32>}, {pipeline_mode = #tpu.pipeline_mode<synchronous>, transform_indices = @transform_7, window_bounds = array<i64: 32, 32>}, {pipeline_mode = #tpu.pipeline_mode<synchronous>, transform_indices = @transform_8, window_bounds = array<i64: 1, 32>}, {pipeline_mode = #tpu.pipeline_mode<synchronous>, transform_indices = @transform_9, window_bounds = array<i64: 32, 32>}, {pipeline_mode = #tpu.pipeline_mode<synchronous>, transform_indices = @transform_10, window_bounds = array<i64: 1, 32>}, {pipeline_mode = #tpu.pipeline_mode<synchronous>, transform_indices = @transform_11, window_bounds = array<i64: 32, 32>}, {pipeline_mode = #tpu.pipeline_mode<synchronous>, transform_indices = @transform_12, window_bounds = array<i64: 1, 32>}, {pipeline_mode = #tpu.pipeline_mode<synchronous>, transform_indices = @transform_13, window_bounds = array<i64: 32, 32>}, {pipeline_mode = #tpu.pipeline_mode<synchronous>, transform_indices = @transform_14, window_bounds = array<i64: 1, 32>}, {pipeline_mode = #tpu.pipeline_mode<synchronous>, transform_indices = @transform_15, window_bounds = array<i64: 32, 128>}, {pipeline_mode = #tpu.pipeline_mode<synchronous>, transform_indices = @transform_16, window_bounds = array<i64: 1, 128>}, {transform_indices = @transform_17, window_bounds = array<i64: 8, 128>}]} {
    %c0 = arith.constant 0 : index
    %c0_0 = arith.constant 0 : index
    %0 = vector.load %arg1[%c0, %c0_0] : memref<8x3xf32, #tpu.memory_space<vmem>>, vector<8x3xf32>
    %1 = arith.truncf %0 : vector<8x3xf32> to vector<8x3xbf16>
    %c0_1 = arith.constant 0 : index
    %c0_2 = arith.constant 0 : index
    %2 = vector.load %arg2[%c0_1, %c0_2] : memref<3x32xbf16, #tpu.memory_space<vmem>>, vector<3x32xbf16>
    %cst = arith.constant dense<0.000000e+00> : vector<8x32xf32>
    %3 = tpu.matmul %1, %2, %cst {dimension_numbers = #tpu.dot_dimension_numbers<[1], [0], [0], [1], [0, 0, 1, 1], [], []>} : vector<8x3xbf16>, vector<3x32xbf16>, vector<8x32xf32> -> vector<8x32xf32>
    %c0_3 = arith.constant 0 : index
    %c0_4 = arith.constant 0 : index
    %4 = vector.load %arg3[%c0_3, %c0_4] : memref<1x32xf32, #tpu.memory_space<vmem>>, vector<1x32xf32>
    %5 = vector.broadcast %4 : vector<1x32xf32> to vector<8x32xf32>
    %6 = arith.addf %3, %5 : vector<8x32xf32>
    %cst_5 = arith.constant 0.000000e+00 : f32
    %7 = vector.broadcast %cst_5 : f32 to vector<8x32xf32>
    %8 = arith.maximumf %6, %7 : vector<8x32xf32>
    %9 = arith.truncf %8 : vector<8x32xf32> to vector<8x32xbf16>
    %c0_6 = arith.constant 0 : index
    %c0_7 = arith.constant 0 : index
    %10 = vector.load %arg4[%c0_6, %c0_7] : memref<32x32xbf16, #tpu.memory_space<vmem>>, vector<32x32xbf16>
    %cst_8 = arith.constant dense<0.000000e+00> : vector<8x32xf32>
    %11 = tpu.matmul %9, %10, %cst_8 {dimension_numbers = #tpu.dot_dimension_numbers<[1], [0], [0], [1], [0, 0, 1, 1], [], []>} : vector<8x32xbf16>, vector<32x32xbf16>, vector<8x32xf32> -> vector<8x32xf32>
    %c0_9 = arith.constant 0 : index
    %c0_10 = arith.constant 0 : index
    %12 = vector.load %arg5[%c0_9, %c0_10] : memref<1x32xf32, #tpu.memory_space<vmem>>, vector<1x32xf32>
    %13 = vector.broadcast %12 : vector<1x32xf32> to vector<8x32xf32>
    %14 = arith.addf %11, %13 : vector<8x32xf32>
    %cst_11 = arith.constant 0.000000e+00 : f32
    %15 = vector.broadcast %cst_11 : f32 to vector<8x32xf32>
    %16 = arith.maximumf %14, %15 : vector<8x32xf32>
    %17 = arith.truncf %16 : vector<8x32xf32> to vector<8x32xbf16>
    %c0_12 = arith.constant 0 : index
    %c0_13 = arith.constant 0 : index
    %18 = vector.load %arg6[%c0_12, %c0_13] : memref<32x32xbf16, #tpu.memory_space<vmem>>, vector<32x32xbf16>
    %cst_14 = arith.constant dense<0.000000e+00> : vector<8x32xf32>
    %19 = tpu.matmul %17, %18, %cst_14 {dimension_numbers = #tpu.dot_dimension_numbers<[1], [0], [0], [1], [0, 0, 1, 1], [], []>} : vector<8x32xbf16>, vector<32x32xbf16>, vector<8x32xf32> -> vector<8x32xf32>
    %c0_15 = arith.constant 0 : index
    %c0_16 = arith.constant 0 : index
    %20 = vector.load %arg7[%c0_15, %c0_16] : memref<1x32xf32, #tpu.memory_space<vmem>>, vector<1x32xf32>
    %21 = vector.broadcast %20 : vector<1x32xf32> to vector<8x32xf32>
    %22 = arith.addf %19, %21 : vector<8x32xf32>
    %cst_17 = arith.constant 0.000000e+00 : f32
    %23 = vector.broadcast %cst_17 : f32 to vector<8x32xf32>
    %24 = arith.maximumf %22, %23 : vector<8x32xf32>
    %25 = arith.truncf %24 : vector<8x32xf32> to vector<8x32xbf16>
    %c0_18 = arith.constant 0 : index
    %c0_19 = arith.constant 0 : index
    %26 = vector.load %arg8[%c0_18, %c0_19] : memref<32x32xbf16, #tpu.memory_space<vmem>>, vector<32x32xbf16>
    %cst_20 = arith.constant dense<0.000000e+00> : vector<8x32xf32>
    %27 = tpu.matmul %25, %26, %cst_20 {dimension_numbers = #tpu.dot_dimension_numbers<[1], [0], [0], [1], [0, 0, 1, 1], [], []>} : vector<8x32xbf16>, vector<32x32xbf16>, vector<8x32xf32> -> vector<8x32xf32>
    %c0_21 = arith.constant 0 : index
    %c0_22 = arith.constant 0 : index
    %28 = vector.load %arg9[%c0_21, %c0_22] : memref<1x32xf32, #tpu.memory_space<vmem>>, vector<1x32xf32>
    %29 = vector.broadcast %28 : vector<1x32xf32> to vector<8x32xf32>
    %30 = arith.addf %27, %29 : vector<8x32xf32>
    %cst_23 = arith.constant 0.000000e+00 : f32
    %31 = vector.broadcast %cst_23 : f32 to vector<8x32xf32>
    %32 = arith.maximumf %30, %31 : vector<8x32xf32>
    %33 = arith.truncf %32 : vector<8x32xf32> to vector<8x32xbf16>
    %c0_24 = arith.constant 0 : index
    %c0_25 = arith.constant 0 : index
    %34 = vector.load %arg10[%c0_24, %c0_25] : memref<32x32xbf16, #tpu.memory_space<vmem>>, vector<32x32xbf16>
    %cst_26 = arith.constant dense<0.000000e+00> : vector<8x32xf32>
    %35 = tpu.matmul %33, %34, %cst_26 {dimension_numbers = #tpu.dot_dimension_numbers<[1], [0], [0], [1], [0, 0, 1, 1], [], []>} : vector<8x32xbf16>, vector<32x32xbf16>, vector<8x32xf32> -> vector<8x32xf32>
    %c0_27 = arith.constant 0 : index
    %c0_28 = arith.constant 0 : index
    %36 = vector.load %arg11[%c0_27, %c0_28] : memref<1x32xf32, #tpu.memory_space<vmem>>, vector<1x32xf32>
    %37 = vector.broadcast %36 : vector<1x32xf32> to vector<8x32xf32>
    %38 = arith.addf %35, %37 : vector<8x32xf32>
    %cst_29 = arith.constant 0.000000e+00 : f32
    %39 = vector.broadcast %cst_29 : f32 to vector<8x32xf32>
    %40 = arith.maximumf %38, %39 : vector<8x32xf32>
    %41 = arith.truncf %40 : vector<8x32xf32> to vector<8x32xbf16>
    %c0_30 = arith.constant 0 : index
    %c0_31 = arith.constant 0 : index
    %42 = vector.load %arg12[%c0_30, %c0_31] : memref<32x32xbf16, #tpu.memory_space<vmem>>, vector<32x32xbf16>
    %cst_32 = arith.constant dense<0.000000e+00> : vector<8x32xf32>
    %43 = tpu.matmul %41, %42, %cst_32 {dimension_numbers = #tpu.dot_dimension_numbers<[1], [0], [0], [1], [0, 0, 1, 1], [], []>} : vector<8x32xbf16>, vector<32x32xbf16>, vector<8x32xf32> -> vector<8x32xf32>
    %c0_33 = arith.constant 0 : index
    %c0_34 = arith.constant 0 : index
    %44 = vector.load %arg13[%c0_33, %c0_34] : memref<1x32xf32, #tpu.memory_space<vmem>>, vector<1x32xf32>
    %45 = vector.broadcast %44 : vector<1x32xf32> to vector<8x32xf32>
    %46 = arith.addf %43, %45 : vector<8x32xf32>
    %cst_35 = arith.constant 0.000000e+00 : f32
    %47 = vector.broadcast %cst_35 : f32 to vector<8x32xf32>
    %48 = arith.maximumf %46, %47 : vector<8x32xf32>
    %49 = arith.truncf %48 : vector<8x32xf32> to vector<8x32xbf16>
    %c0_36 = arith.constant 0 : index
    %c0_37 = arith.constant 0 : index
    %50 = vector.load %arg14[%c0_36, %c0_37] : memref<32x32xbf16, #tpu.memory_space<vmem>>, vector<32x32xbf16>
    %cst_38 = arith.constant dense<0.000000e+00> : vector<8x32xf32>
    %51 = tpu.matmul %49, %50, %cst_38 {dimension_numbers = #tpu.dot_dimension_numbers<[1], [0], [0], [1], [0, 0, 1, 1], [], []>} : vector<8x32xbf16>, vector<32x32xbf16>, vector<8x32xf32> -> vector<8x32xf32>
    %c0_39 = arith.constant 0 : index
    %c0_40 = arith.constant 0 : index
    %52 = vector.load %arg15[%c0_39, %c0_40] : memref<1x32xf32, #tpu.memory_space<vmem>>, vector<1x32xf32>
    %53 = vector.broadcast %52 : vector<1x32xf32> to vector<8x32xf32>
    %54 = arith.addf %51, %53 : vector<8x32xf32>
    %cst_41 = arith.constant 0.000000e+00 : f32
    %55 = vector.broadcast %cst_41 : f32 to vector<8x32xf32>
    %56 = arith.maximumf %54, %55 : vector<8x32xf32>
    %57 = arith.truncf %56 : vector<8x32xf32> to vector<8x32xbf16>
    %c0_42 = arith.constant 0 : index
    %c0_43 = arith.constant 0 : index
    %58 = vector.load %arg16[%c0_42, %c0_43] : memref<32x128xbf16, #tpu.memory_space<vmem>>, vector<32x128xbf16>
    %cst_44 = arith.constant dense<0.000000e+00> : vector<8x128xf32>
    %59 = tpu.matmul %57, %58, %cst_44 {dimension_numbers = #tpu.dot_dimension_numbers<[1], [0], [0], [1], [0, 0, 1, 1], [], []>} : vector<8x32xbf16>, vector<32x128xbf16>, vector<8x128xf32> -> vector<8x128xf32>
    %c0_45 = arith.constant 0 : index
    %c0_46 = arith.constant 0 : index
    %60 = vector.load %arg17[%c0_45, %c0_46] : memref<1x128xf32, #tpu.memory_space<vmem>>, vector<1x128xf32>
    %61 = vector.broadcast %60 : vector<1x128xf32> to vector<8x128xf32>
    %62 = arith.addf %59, %61 : vector<8x128xf32>
    %c0_47 = arith.constant 0 : index
    %c0_48 = arith.constant 0 : index
    %63 = vector.load %arg18[%c0_47, %c0_48] : memref<8x128xf32, #tpu.memory_space<vmem>>, vector<8x128xf32>
    tpu.vector_store %arg18[%c0_47, %c0_48], %62 {strides = array<i32>} : memref<8x128xf32, #tpu.memory_space<vmem>>, vector<8x128xf32>,
    return
  }
  func.func @transform_0(%arg0: i32) -> (i32, i32) {
    %c0_i32 = arith.constant 0 : i32
    %c0_i32_0 = arith.constant 0 : i32
    return %arg0, %c0_i32 : i32, i32
  }
  func.func @transform_1(%arg0: i32) -> (i32, i32) {
    %c0_i32 = arith.constant 0 : i32
    %c0_i32_0 = arith.constant 0 : i32
    %c0_i32_1 = arith.constant 0 : i32
    return %c0_i32, %c0_i32_0 : i32, i32
  }
  func.func @transform_2(%arg0: i32) -> (i32, i32) {
    %c0_i32 = arith.constant 0 : i32
    %c0_i32_0 = arith.constant 0 : i32
    %c0_i32_1 = arith.constant 0 : i32
    return %c0_i32, %c0_i32_0 : i32, i32
  }
  func.func @transform_3(%arg0: i32) -> (i32, i32) {
    %c0_i32 = arith.constant 0 : i32
    %c0_i32_0 = arith.constant 0 : i32
    %c0_i32_1 = arith.constant 0 : i32
    return %c0_i32, %c0_i32_0 : i32, i32
  }
  func.func @transform_4(%arg0: i32) -> (i32, i32) {
    %c0_i32 = arith.constant 0 : i32
    %c0_i32_0 = arith.constant 0 : i32
    %c0_i32_1 = arith.constant 0 : i32
    return %c0_i32, %c0_i32_0 : i32, i32
  }
  func.func @transform_5(%arg0: i32) -> (i32, i32) {
    %c0_i32 = arith.constant 0 : i32
    %c0_i32_0 = arith.constant 0 : i32
    %c0_i32_1 = arith.constant 0 : i32
    return %c0_i32, %c0_i32_0 : i32, i32
  }
  func.func @transform_6(%arg0: i32) -> (i32, i32) {
    %c0_i32 = arith.constant 0 : i32
    %c0_i32_0 = arith.constant 0 : i32
    %c0_i32_1 = arith.constant 0 : i32
    return %c0_i32, %c0_i32_0 : i32, i32
  }
  func.func @transform_7(%arg0: i32) -> (i32, i32) {
    %c0_i32 = arith.constant 0 : i32
    %c0_i32_0 = arith.constant 0 : i32
    %c0_i32_1 = arith.constant 0 : i32
    return %c0_i32, %c0_i32_0 : i32, i32
  }
  func.func @transform_8(%arg0: i32) -> (i32, i32) {
    %c0_i32 = arith.constant 0 : i32
    %c0_i32_0 = arith.constant 0 : i32
    %c0_i32_1 = arith.constant 0 : i32
    return %c0_i32, %c0_i32_0 : i32, i32
  }
  func.func @transform_9(%arg0: i32) -> (i32, i32) {
    %c0_i32 = arith.constant 0 : i32
    %c0_i32_0 = arith.constant 0 : i32
    %c0_i32_1 = arith.constant 0 : i32
    return %c0_i32, %c0_i32_0 : i32, i32
  }
  func.func @transform_10(%arg0: i32) -> (i32, i32) {
    %c0_i32 = arith.constant 0 : i32
    %c0_i32_0 = arith.constant 0 : i32
    %c0_i32_1 = arith.constant 0 : i32
    return %c0_i32, %c0_i32_0 : i32, i32
  }
  func.func @transform_11(%arg0: i32) -> (i32, i32) {
    %c0_i32 = arith.constant 0 : i32
    %c0_i32_0 = arith.constant 0 : i32
    %c0_i32_1 = arith.constant 0 : i32
    return %c0_i32, %c0_i32_0 : i32, i32
  }
  func.func @transform_12(%arg0: i32) -> (i32, i32) {
    %c0_i32 = arith.constant 0 : i32
    %c0_i32_0 = arith.constant 0 : i32
    %c0_i32_1 = arith.constant 0 : i32
    return %c0_i32, %c0_i32_0 : i32, i32
  }
  func.func @transform_13(%arg0: i32) -> (i32, i32) {
    %c0_i32 = arith.constant 0 : i32
    %c0_i32_0 = arith.constant 0 : i32
    %c0_i32_1 = arith.constant 0 : i32
    return %c0_i32, %c0_i32_0 : i32, i32
  }
  func.func @transform_14(%arg0: i32) -> (i32, i32) {
    %c0_i32 = arith.constant 0 : i32
    %c0_i32_0 = arith.constant 0 : i32
    %c0_i32_1 = arith.constant 0 : i32
    return %c0_i32, %c0_i32_0 : i32, i32
  }
  func.func @transform_15(%arg0: i32) -> (i32, i32) {
    %c0_i32 = arith.constant 0 : i32
    %c0_i32_0 = arith.constant 0 : i32
    %c0_i32_1 = arith.constant 0 : i32
    return %c0_i32, %c0_i32_0 : i32, i32
  }
  func.func @transform_16(%arg0: i32) -> (i32, i32) {
    %c0_i32 = arith.constant 0 : i32
    %c0_i32_0 = arith.constant 0 : i32
    %c0_i32_1 = arith.constant 0 : i32
    return %c0_i32, %c0_i32_0 : i32, i32
  }
  func.func @transform_17(%arg0: i32) -> (i32, i32) {
    %c0_i32 = arith.constant 0 : i32
    %c0_i32_0 = arith.constant 0 : i32
    return %arg0, %c0_i32 : i32, i32
  }
}

</mosaic_0001>

<bundles_post_ra>
// kernel: tpu_custom_call.1
= control target key start
LH: loop header
LB: loop body
LE: loop exit
PB: predicated region body
PF: predicated region fallthrough
CT: control target
= control target key end

     0   :  { %s1473_s0 = inlined_call_operand.vmem [shape: f32[8,3], index: 0, kind: input, shape index: {}]   ;;  %s1474_s1 = inlined_call_operand.hbm [shape: bf16[3,32], index: 1, kind: input, shape index: {}]   ;;  %s1475_s2 = inlined_call_operand.vmem [shape: f32[1,32], index: 2, kind: input, shape index: {}]   ;;  %s1476_s3 = inlined_call_operand.vmem [shape: bf16[32,32], index: 3, kind: input, shape index: {}]   ;;  %s1477_s4 = inlined_call_operand.hbm [shape: f32[1,32], index: 4, kind: input, shape index: {}]   ;;  %s1478_s5 = inlined_call_operand.hbm [shape: bf16[32,32], index: 5, kind: input, shape index: {}]   ;;  %s1479_s6 = inlined_call_operand.hbm [shape: f32[1,32], index: 6, kind: input, shape index: {}]   ;;  %s1480_s7 = inlined_call_operand.vmem [shape: bf16[32,32], index: 7, kind: input, shape index: {}]   ;;  %s1481_s8 = inlined_call_operand.hbm [shape: f32[1,32], index: 8, kind: input, shape index: {}]   ;;  %s1482_s9 = inlined_call_operand.hbm [shape: bf16[32,32], index: 9, kind: input, shape index: {}]   ;;  %s1483_s10 = inlined_call_operand.hbm [shape: f32[1,32], index: 10, kind: input, shape index: {}]   ;;  %s1484_s11 = inlined_call_operand.vmem [shape: bf16[32,32], index: 11, kind: input, shape index: {}]   ;;  %s1485_s12 = inlined_call_operand.hbm [shape: f32[1,32], index: 12, kind: input, shape index: {}]   ;;  %s1486_s13 = inlined_call_operand.hbm [shape: bf16[32,32], index: 13, kind: input, shape index: {}]   ;;  %s1487_s14 = inlined_call_operand.hbm [shape: f32[1,32], index: 14, kind: input, shape index: {}]   ;;  %s1488_s15 = inlined_call_operand.vmem [shape: bf16[32,128], index: 15, kind: input, shape index: {}]   ;;  %s1489_s16 = inlined_call_operand.vmem [shape: f32[1,128], index: 16, kind: input, shape index: {}]   ;;  %s1490_s17 = inlined_call_operand.hbm [shape: f32[8,128], index: 17, kind: output, shape index: {}]  }
   0x1   :  { %1492 = sst [smem:[#allocation27_spill]] %s1473_s0 }
   0x2   :  { %1493 = sst [smem:[#allocation28_spill]] %s1474_s1 }
   0x3   :  { %22 = vsyncpa [#allocation3], 0 }
   0x4   :  { %23 = vsyncpa [#allocation6], 0 }
   0x5   :  { %24 = vsyncpa [#allocation9], 0 }
   0x6   :  { %25 = vsyncpa [#allocation12], 0 }
   0x7   :  { %26 = vsyncpa [#allocation15], 0 }
   0x8   :  { %27 = vsyncpa [#allocation18], 0 }
   0x9   :  { %28 = vsyncpa [#allocation4], 0  ;;  %s1140_s24 = smov [#allocation5]   ;;  %s1141_s26 = smov [#allocation8]  }
   0xa   :  { %s51_s25 = sshll.u32 %s1140_s24, 4  ;;  %s73_s27 = sshll.u32 %s1141_s26, 4  ;;  %s52_s25 = int_to_ptr.vmem [resolvable:$true] %s51_s25  ;;  %s74_s27 = int_to_ptr.vmem [resolvable:$true] %s73_s27 }
   0xb   :  { %s884_s0 = scalar_lea.hbm %s1477_s4, 16 }
   0xc   :  { %p885_p0 = scmp.ne.s32.totalorder %s1477_s4, %s884_s0  ;;  %p888_p1 = scmp.lt.u32.totalorder %s884_s0, %s1477_s4 }
   0xe   :  { %p890_p2 = pnand %p888_p1, %p885_p0 }
  0x10   :  { %893 = shalt.err (!%p890_p2)
}
  0x11   :  { %s894_s20 = scalar_lea.vmem %s52_s25, 16  ;;  %s898_s21 = scalar_lea.vmem %s52_s25, 32 }
  0x12   :  { %p895_p3 = scmp.ne.s32.totalorder %s52_s25, %s894_s20  ;;  %p899_p4 = scmp.lt.s32.totalorder %s52_s25, %s52_s25 }
  0x13   :  { %p900_p5 = scmp.lt.s32.totalorder %s898_s21, %s894_s20 }
  0x15   :  { %p901_p6 = por %p900_p5, %p899_p4 }
  0x17   :  { %p902_p7 = pnand %p901_p6, %p895_p3 }
  0x19   :  { %905 = shalt.err (!%p902_p7)
}
  0x1a   :  { %54 = dma.hbm_to_vmem [thread:$0]  %s1477_s4, 16, %s52_s25, [#allocation6]  }
  0x1b   :  { %s906_s28 = scalar_lea.hbm %s1479_s6, 16 }
  0x1c   :  { %p907_p8 = scmp.ne.s32.totalorder %s1479_s6, %s906_s28  ;;  %p910_p9 = scmp.lt.u32.totalorder %s906_s28, %s1479_s6 }
  0x1e   :  { %p912_p10 = pnand %p910_p9, %p907_p8 }
  0x20   :  { %915 = shalt.err (!%p912_p10)
}
  0x21   :  { %s916_s19 = scalar_lea.vmem %s74_s27, 16  ;;  %s920_s1 = scalar_lea.vmem %s74_s27, 32 }
  0x22   :  { %p917_p11 = scmp.ne.s32.totalorder %s74_s27, %s916_s19  ;;  %p921_p12 = scmp.lt.s32.totalorder %s74_s27, %s74_s27 }
  0x23   :  { %p922_p13 = scmp.lt.s32.totalorder %s920_s1, %s916_s19 }
  0x25   :  { %p923_p0 = por %p922_p13, %p921_p12 }
  0x27   :  { %p924_p1 = pnand %p923_p0, %p917_p11 }
  0x29   :  { %927 = shalt.err (!%p924_p1)
}
  0x2a   :  { %76 = dma.hbm_to_vmem [thread:$0]  %s1479_s6, 16, %s74_s27, [#allocation9]  }
  0x2b   :  { %s1142_s20 = smov [#allocation11]   ;;  %s1143_s22 = smov [#allocation14]  }
  0x2c   :  { %s94_s21 = sshll.u32 %s1142_s20, 4  ;;  %s119_s23 = sshll.u32 %s1143_s22, 4  ;;  %s95_s21 = int_to_ptr.vmem [resolvable:$true] %s94_s21  ;;  %s1270_s23 = int_to_ptr.vmem [resolvable:$true] %s119_s23 }
  0x2d   :  { %s928_s28 = scalar_lea.hbm %s1482_s9, 256 }
  0x2e   :  { %p929_p2 = scmp.ne.s32.totalorder %s1482_s9, %s928_s28  ;;  %p932_p3 = scmp.lt.u32.totalorder %s928_s28, %s1482_s9 }
  0x30   :  { %p934_p4 = pnand %p932_p3, %p929_p2 }
  0x32   :  { %937 = shalt.err (!%p934_p4)
}
  0x33   :  { %s938_s6 = scalar_lea.vmem %s95_s21, 256  ;;  %p943_p6 = scmp.lt.s32.totalorder %s95_s21, %s95_s21 }
  0x34   :  { %p939_p5 = scmp.ne.s32.totalorder %s95_s21, %s938_s6  ;;  %p944_p7 = scmp.lt.s32.totalorder %s938_s6, %s938_s6 }
  0x36   :  { %p945_p8 = por %p944_p7, %p943_p6 }
  0x38   :  { %p946_p9 = pnand %p945_p8, %p939_p5 }
  0x3a   :  { %949 = shalt.err (!%p946_p9)
}
  0x3b   :  { %s1144_s27 = smov 64   ;;  %s1145_s19 = smov 4  }
  0x3c   :  { %100 = dma.hbm_to_vmem [thread:$0]  %s1482_s9, 256, %s95_s21, [#allocation12], %s1144_s27, %s1144_s27, %s1145_s19  }
  0x3d   :  { %s950_s22 = scalar_lea.hbm %s1485_s12, 16 }
  0x3e   :  { %p951_p10 = scmp.ne.s32.totalorder %s1485_s12, %s950_s22  ;;  %p954_p11 = scmp.lt.u32.totalorder %s950_s22, %s1485_s12 }
  0x40   :  { %p956_p12 = pnand %p954_p11, %p951_p10 }
  0x42   :  { %959 = shalt.err (!%p956_p12)
}
  0x43   :  { %s960_s0 = scalar_lea.vmem %s1270_s23, 16  ;;  %s964_s9 = scalar_lea.vmem %s1270_s23, 32 }
  0x44   :  { %p961_p13 = scmp.ne.s32.totalorder %s1270_s23, %s960_s0  ;;  %p965_p0 = scmp.lt.s32.totalorder %s1270_s23, %s1270_s23 }
  0x45   :  { %p966_p1 = scmp.lt.s32.totalorder %s964_s9, %s960_s0 }
  0x47   :  { %p967_p2 = por %p966_p1, %p965_p0 }
  0x49   :  { %p968_p3 = pnand %p967_p2, %p961_p13 }
  0x4b   :  { %971 = shalt.err (!%p968_p3)
}
  0x4c   :  { %122 = dma.hbm_to_vmem [thread:$0]  %s1485_s12, 16, %s1270_s23, [#allocation15]  }
  0x4d   :  { %s1146_s18 = smov [#allocation2]   ;;  %s1147_s1 = smov [#allocation7]  }
  0x4e   :  { %s37_s6 = sshll.u32 %s1146_s18, 4  ;;  %s60_s4 = sshll.u32 %s1147_s1, 4  ;;  %s38_s6 = int_to_ptr.vmem [resolvable:$true] %s37_s6  ;;  %s1305_s4 = int_to_ptr.vmem [resolvable:$true] %s60_s4 }
  0x4f   :  { %s1494_s22 = sld [smem:[#allocation28_spill]] }
  0x55   :  { %s972_s24 = scalar_lea.hbm %s1494_s22, 32 }
  0x56   :  { %p973_p4 = scmp.ne.s32.totalorder %s1494_s22, %s972_s24  ;;  %p976_p5 = scmp.lt.u32.totalorder %s972_s24, %s1494_s22 }
  0x58   :  { %p978_p6 = pnand %p976_p5, %p973_p4 }
  0x5a   :  { %981 = shalt.err (!%p978_p6)
}
  0x5b   :  { %s982_s12 = scalar_lea.vmem %s38_s6, 32  ;;  %p987_p8 = scmp.lt.s32.totalorder %s38_s6, %s38_s6 }
  0x5c   :  { %p983_p7 = scmp.ne.s32.totalorder %s38_s6, %s982_s12  ;;  %p988_p9 = scmp.lt.s32.totalorder %s982_s12, %s982_s12 }
  0x5e   :  { %p989_p10 = por %p988_p9, %p987_p8 }
  0x60   :  { %p990_p11 = pnand %p989_p10, %p983_p7 }
  0x62   :  { %993 = shalt.err (!%p990_p11)
}
  0x63   :  { %40 = dma.hbm_to_vmem [thread:$0]  %s1494_s22, 32, %s38_s6, [#allocation3]  }
  0x64   :  { %s994_s18 = scalar_lea.hbm %s1478_s5, 256 }
  0x65   :  { %p995_p12 = scmp.ne.s32.totalorder %s1478_s5, %s994_s18  ;;  %p998_p13 = scmp.lt.u32.totalorder %s994_s18, %s1478_s5 }
  0x67   :  { %p1000_p0 = pnand %p998_p13, %p995_p12 }
  0x69   :  { %1003 = shalt.err (!%p1000_p0)
}
  0x6a   :  { %s1004_s26 = scalar_lea.vmem %s1305_s4, 256  ;;  %p1009_p2 = scmp.lt.s32.totalorder %s1305_s4, %s1305_s4 }
  0x6b   :  { %p1005_p1 = scmp.ne.s32.totalorder %s1305_s4, %s1004_s26  ;;  %p1010_p3 = scmp.lt.s32.totalorder %s1004_s26, %s1004_s26 }
  0x6d   :  { %p1011_p4 = por %p1010_p3, %p1009_p2 }
  0x6f   :  { %p1012_p5 = pnand %p1011_p4, %p1005_p1 }
  0x71   :  { %1015 = shalt.err (!%p1012_p5)
}
  0x72   :  { %66 = dma.hbm_to_vmem [thread:$0]  %s1478_s5, 256, %s1305_s4, [#allocation6], %s1144_s27, %s1144_s27, %s1145_s19  }
  0x73   :  { %s1148_s28 = smov [#allocation10]   ;;  %s1149_s0 = smov [#allocation13]  }
  0x74   :  { %s85_s29 = sshll.u32 %s1148_s28, 4  ;;  %s107_s12 = sshll.u32 %s1149_s0, 4  ;;  %s86_s29 = int_to_ptr.vmem [resolvable:$true] %s85_s29  ;;  %s108_s12 = int_to_ptr.vmem [resolvable:$true] %s107_s12 }
  0x75   :  { %s1016_s21 = scalar_lea.hbm %s1481_s8, 16 }
  0x76   :  { %p1017_p6 = scmp.ne.s32.totalorder %s1481_s8, %s1016_s21  ;;  %p1020_p7 = scmp.lt.u32.totalorder %s1016_s21, %s1481_s8 }
  0x78   :  { %p1022_p8 = pnand %p1020_p7, %p1017_p6 }
  0x7a   :  { %1025 = shalt.err (!%p1022_p8)
}
  0x7b   :  { %s1026_s5 = scalar_lea.vmem %s86_s29, 16  ;;  %s1030_s4 = scalar_lea.vmem %s86_s29, 32 }
  0x7c   :  { %p1027_p9 = scmp.ne.s32.totalorder %s86_s29, %s1026_s5  ;;  %p1031_p10 = scmp.lt.s32.totalorder %s86_s29, %s86_s29 }
  0x7d   :  { %p1032_p11 = scmp.lt.s32.totalorder %s1030_s4, %s1026_s5 }
  0x7f   :  { %p1033_p12 = por %p1032_p11, %p1031_p10 }
  0x81   :  { %p1034_p13 = pnand %p1033_p12, %p1027_p9 }
  0x83   :  { %1037 = shalt.err (!%p1034_p13)
}
  0x84   :  { %88 = dma.hbm_to_vmem [thread:$0]  %s1481_s8, 16, %s86_s29, [#allocation9]  }
  0x85   :  { %s1038_s22 = scalar_lea.hbm %s1483_s10, 16 }
  0x86   :  { %p1039_p0 = scmp.ne.s32.totalorder %s1483_s10, %s1038_s22  ;;  %p1042_p1 = scmp.lt.u32.totalorder %s1038_s22, %s1483_s10 }
  0x88   :  { %p1044_p2 = pnand %p1042_p1, %p1039_p0 }
  0x8a   :  { %1047 = shalt.err (!%p1044_p2)
}
  0x8b   :  { %s1048_s21 = scalar_lea.vmem %s108_s12, 16  ;;  %s1052_s30 = scalar_lea.vmem %s108_s12, 32 }
  0x8c   :  { %p1049_p3 = scmp.ne.s32.totalorder %s108_s12, %s1048_s21  ;;  %p1053_p4 = scmp.lt.s32.totalorder %s108_s12, %s108_s12 }
  0x8d   :  { %p1054_p5 = scmp.lt.s32.totalorder %s1052_s30, %s1048_s21 }
  0x8f   :  { %p1055_p6 = por %p1054_p5, %p1053_p4 }
  0x91   :  { %p1056_p7 = pnand %p1055_p6, %p1049_p3 }
  0x93   :  { %1059 = shalt.err (!%p1056_p7)
}
  0x94   :  { %110 = dma.hbm_to_vmem [thread:$0]  %s1483_s10, 16, %s108_s12, [#allocation12]  }
  0x95   :  { %s1150_s18 = smov [#allocation16]   ;;  %s1151_s25 = smov [#allocation17]  }
  0x96   :  { %s128_s1 = sshll.u32 %s1150_s18, 4  ;;  %s141_s5 = sshll.u32 %s1151_s25, 4  ;;  %s129_s1 = int_to_ptr.vmem [resolvable:$true] %s128_s1  ;;  %s142_s5 = int_to_ptr.vmem [resolvable:$true] %s141_s5 }
  0x97   :  { %s1060_s24 = scalar_lea.hbm %s1486_s13, 256 }
  0x98   :  { %p1061_p8 = scmp.ne.s32.totalorder %s1486_s13, %s1060_s24  ;;  %p1064_p9 = scmp.lt.u32.totalorder %s1060_s24, %s1486_s13 }
  0x9a   :  { %p1066_p10 = pnand %p1064_p9, %p1061_p8 }
  0x9c   :  { %1069 = shalt.err (!%p1066_p10)
}
  0x9d   :  { %s1070_s10 = scalar_lea.vmem %s129_s1, 256  ;;  %p1075_p12 = scmp.lt.s32.totalorder %s129_s1, %s129_s1 }
  0x9e   :  { %p1071_p11 = scmp.ne.s32.totalorder %s129_s1, %s1070_s10  ;;  %p1076_p13 = scmp.lt.s32.totalorder %s1070_s10, %s1070_s10 }
  0xa0   :  { %p1077_p0 = por %p1076_p13, %p1075_p12 }
  0xa2   :  { %p1078_p1 = pnand %p1077_p0, %p1071_p11 }
  0xa4   :  { %1081 = shalt.err (!%p1078_p1)
}
  0xa5   :  { %134 = dma.hbm_to_vmem [thread:$0]  %s1486_s13, 256, %s129_s1, [#allocation15], %s1144_s27, %s1144_s27, %s1145_s19  }
  0xa6   :  { %s1082_s21 = scalar_lea.hbm %s1487_s14, 16 }
  0xa7   :  { %p1083_p2 = scmp.ne.s32.totalorder %s1487_s14, %s1082_s21  ;;  %p1086_p3 = scmp.lt.u32.totalorder %s1082_s21, %s1487_s14 }
  0xa9   :  { %p1088_p4 = pnand %p1086_p3, %p1083_p2 }
  0xab   :  { %1091 = shalt.err (!%p1088_p4)
}
  0xac   :  { %s1092_s25 = scalar_lea.vmem %s142_s5, 16  ;;  %s1096_s4 = scalar_lea.vmem %s142_s5, 32 }
  0xad   :  { %p1093_p5 = scmp.ne.s32.totalorder %s142_s5, %s1092_s25  ;;  %p1097_p6 = scmp.lt.s32.totalorder %s142_s5, %s142_s5 }
  0xae   :  { %p1098_p7 = scmp.lt.s32.totalorder %s1096_s4, %s1092_s25 }
  0xb0   :  { %p1099_p8 = por %p1098_p7, %p1097_p6 }
  0xb2   :  { %p1100_p9 = pnand %p1099_p8, %p1093_p5 }
  0xb4   :  { %1103 = shalt.err (!%p1100_p9)
}
  0xb5   :  { %144 = dma.hbm_to_vmem [thread:$0]  %s1487_s14, 16, %s142_s5, [#allocation18]  }
  0xb6   :  { %1126 = dma.done.wait [#allocation3], 32  }
  0xb7   :  { %1127 = vsyncadd [#allocation3], 4294967264 }
  0xb8   :  { %1128 = dma.done.wait [#allocation6], 272  }
  0xb9   :  { %1129 = vsyncadd [#allocation6], 4294967024 }
  0xba   :  { %1130 = dma.done.wait [#allocation9], 32  }
  0xbb   :  { %1131 = vsyncadd [#allocation9], 4294967264 }
  0xbc   :  { %1132 = dma.done.wait [#allocation12], 272  }
  0xbd   :  { %1133 = vsyncadd [#allocation12], 4294967024 }
  0xbe   :  { %1134 = dma.done.wait [#allocation15], 272  }
  0xbf   :  { %1135 = vsyncadd [#allocation15], 4294967024 }
  0xc0   :  { %1136 = dma.done.wait [#allocation18], 16  }
  0xc1   :  { %1137 = vsyncadd [#allocation18], 4294967280  ;;  %vm194_vm0 = vcmask 1040384   ;;  %v1152_v0 = vmov 0.0   ;;  %vm195_vm1 = vcmask 1041408   ;;  %v1153_v1 = vmov 65535  }
  0xc2   :  { %792 = vmatprep.subr.bf16.mxu0 %v1152_v0  ;;  %798 = vmatprep.subr.bf16.mxu1 %v1152_v0  ;;  %v196_v2 = vsel %vm194_vm0, 4294967295, %v1153_v1  ;;  %vm1154_vm2 = vmmov 0   ;;  %v182_v4 = vld [vmem:[#allocation2] sm:$0x3]  ;;  %s1495_s1 = sld [smem:[#allocation27_spill]]  ;;  %vm190_vm3 = vcmask 23552  }
  0xc3   :  { %794 = vmatprep.mubr.msk.bf16.mxu0 %vm1154_vm2, %v1152_v0  ;;  %802 = vmatprep.mubr.msk.bf16.mxu1 %vm1154_vm2, %v1152_v0  ;;  %v197_v3 = vsel %vm195_vm1, %v196_v2, 0  ;;  %v870_v8 = vld [vmem:[%s1476_s3] sm:$0xff]   ;;  %v871_v9 = vld [vmem:[%s1476_s3 + $0x8] sm:$0xff]   ;;  %vm266_vm4 = vcmask 261120   ;;  %v876_v30 = vld [vmem:[#allocation11] sm:$0xff]   ;;  %s1155_s18 = smov [#allocation19]  }
  0xc4   :  { %v199_v6 = vand.u32 %v197_v3, %v182_v4  ;;  %799 = vmatpush3.bf16.msra.mxu1 %v870_v8  ;;  %v872_v10 = vld [vmem:[#allocation7] sm:$0xff]   ;;  %v739_v11 = vld [vmem:[%s1475_s2] ss:$0 sm:$0xff]  ;;  %v873_v19 = vld [vmem:[#allocation7 + $0x8] sm:$0xff]   ;;  %s725_s25 = sshll.u32 %s1155_s18, 4  ;;  %s726_s25 = int_to_ptr.vmem [resolvable:$true] %s725_s25 }
  0xc5   :  { %800 = vmatprep.subr.bf16.mxu1 %v1152_v0  ;;  %v874_v20 = vld [vmem:[%s1480_s7] sm:$0xff]   ;;  %v875_v29 = vld [vmem:[%s1480_s7 + $0x8] sm:$0xff]   ;;  %v745_v31 = vld [vmem:[#allocation8] ss:$0 sm:$0xff]  ;;  %p1109_p11 = scmp.lt.s32.totalorder %s726_s25, %s726_s25 }
  0xc6   :  { %793 = vmatpush3.bf16.msra.mxu0 %v199_v6  ;;  %v741_v21 = vld [vmem:[#allocation5] ss:$0 sm:$0xff]  ;;  %v749_v41 = vld [vmem:[#allocation10] ss:$0 sm:$0xff]  ;;  %v879_v49 = vld [vmem:[%s1484_s11 + $0x8] sm:$0xff]  }
  0xc7   :  { %806 = vmatprep.subr.bf16.mxu0 %v1152_v0  ;;  %v877_v39 = vld [vmem:[#allocation11 + $0x8] sm:$0xff]   ;;  %v880_v50 = vld [vmem:[#allocation16] sm:$0xff]   ;;  %v753_v51 = vld [vmem:[#allocation13] ss:$0 sm:$0xff] }
  0xc8   :  { %v180_v5 = vld [vmem:[%s1495_s1] sm:$0xff]  ;;  %801 = vmatpush3.bf16.msra.mxu1 %v871_v9  ;;  %v881_v59 = vld [vmem:[#allocation16 + $0x8] sm:$0xff]   ;;  %v757_v61 = vld [vmem:[#allocation14] ss:$0 sm:$0xff] }
  0xc9   :  { %v181_v7 = vpack.c.bf16 %v180_v5, %v180_v5  ;;  %814 = vmatprep.subr.bf16.mxu1 %v1152_v0  ;;  %v878_v40 = vld [vmem:[%s1484_s11] sm:$0xff]   ;;  %v883_v6 = vld [vmem:[%s1488_s15 + $0x8] sm:$0xff]  }
  0xca   :  { %v882_v60 = vld [vmem:[%s1488_s15] sm:$0xff]   ;;  %s1104_s15 = scalar_lea.vmem %s726_s25, 128 }
  0xcb   :  { %795 = vmatmul.mubr.msk.bf16.vlgmr.msra.gmra.mrb[0].mxu0 %vm190_vm3, %v181_v7  ;;  %v761_v7 = vld [vmem:[#allocation17] ss:$0 sm:$0xff]  ;;  %p1105_p10 = scmp.ne.s32.totalorder %s726_s25, %s1104_s15  ;;  %p1110_p12 = scmp.lt.s32.totalorder %s1104_s15, %s1104_s15 }
  0xcc   :  { %810 = vmatprep.mubr.msk.bf16.mxu0 %vm1154_vm2, %v1152_v0  ;;  %807 = vmatpush3.bf16.msra.mxu0 %v872_v10 }
  0xcd   :  { %808 = vmatprep.subr.bf16.mxu0 %v1152_v0  ;;  %p1111_p13 = por %p1110_p12, %p1109_p11 }
  0xcf   :  { %p1112_p0 = pnand %p1111_p13, %p1105_p10 }
  0xd0   :  { %809 = vmatpush3.bf16.msra.mxu0 %v873_v19 }
  0xd1   :  { %822 = vmatprep.subr.bf16.mxu0 %v1152_v0 }
 0x19e   :  { %v235_v12 = vpop.f32.mrb[0].mxu0 }
 0x19f   :  { %v236_v13 = vadd.f32 %v739_v11, %v235_v12  ;;  %v796_v14 = vpop.f32.mrb[1].mxu0 }
 0x1a0   :  { %v238_v15 = vpop.f32.mrb[2].mxu0  ;;  %v765_v14 = vld [vmem:[%s1489_s16] ss:$0 sm:$0xff] }
 0x1a1   :  { %v241_v16 = vmax.f32 %v236_v13, 0.0  ;;  %v797_v17 = vpop.f32.mrb[3].mxu0 }
 0x1a3   :  { %v242_v18 = vpack.c.bf16 %v241_v16, %v241_v16 }
 0x1a5   :  { %803 = vmatmul.mubr.msk.bf16.vlgmr.msra.gmra.mrb[0].mxu1 %vm266_vm4, %v242_v18 }
 0x1a6   :  { %818 = vmatprep.mubr.msk.bf16.mxu1 %vm1154_vm2, %v1152_v0  ;;  %815 = vmatpush3.bf16.msra.mxu1 %v874_v20 }
 0x1a7   :  { %816 = vmatprep.subr.bf16.mxu1 %v1152_v0 }
 0x1aa   :  { %817 = vmatpush3.bf16.msra.mxu1 %v875_v29 }
 0x1ab   :  { %830 = vmatprep.subr.bf16.mxu1 %v1152_v0 }
 0x278   :  { %v304_v22 = vpop.f32.mrb[0].mxu1 }
 0x279   :  { %v305_v23 = vadd.f32 %v741_v21, %v304_v22  ;;  %v804_v24 = vpop.f32.mrb[1].mxu1 }
 0x27a   :  { %v307_v25 = vpop.f32.mrb[2].mxu1 }
 0x27b   :  { %v310_v26 = vmax.f32 %v305_v23, 0.0  ;;  %v805_v27 = vpop.f32.mrb[3].mxu1 }
 0x27d   :  { %v311_v28 = vpack.c.bf16 %v310_v26, %v310_v26 }
 0x27f   :  { %811 = vmatmul.mubr.msk.bf16.vlgmr.msra.gmra.mrb[4].mxu0 %vm266_vm4, %v311_v28 }
 0x280   :  { %826 = vmatprep.mubr.msk.bf16.mxu0 %vm1154_vm2, %v1152_v0  ;;  %823 = vmatpush3.bf16.msra.mxu0 %v876_v30 }
 0x281   :  { %824 = vmatprep.subr.bf16.mxu0 %v1152_v0 }
 0x284   :  { %825 = vmatpush3.bf16.msra.mxu0 %v877_v39 }
 0x285   :  { %838 = vmatprep.subr.bf16.mxu0 %v1152_v0 }
 0x352   :  { %v372_v32 = vpop.f32.mrb[4].mxu0 }
 0x353   :  { %v373_v33 = vadd.f32 %v745_v31, %v372_v32  ;;  %v812_v34 = vpop.f32.mrb[5].mxu0 }
 0x354   :  { %v375_v35 = vpop.f32.mrb[6].mxu0 }
 0x355   :  { %v378_v36 = vmax.f32 %v373_v33, 0.0  ;;  %v813_v37 = vpop.f32.mrb[7].mxu0 }
 0x357   :  { %v379_v38 = vpack.c.bf16 %v378_v36, %v378_v36 }
 0x359   :  { %819 = vmatmul.mubr.msk.bf16.vlgmr.msra.gmra.mrb[4].mxu1 %vm266_vm4, %v379_v38 }
 0x35a   :  { %834 = vmatprep.mubr.msk.bf16.mxu1 %vm1154_vm2, %v1152_v0  ;;  %831 = vmatpush3.bf16.msra.mxu1 %v878_v40 }
 0x35b   :  { %832 = vmatprep.subr.bf16.mxu1 %v1152_v0 }
 0x35e   :  { %833 = vmatpush3.bf16.msra.mxu1 %v879_v49 }
 0x35f   :  { %846 = vmatprep.subr.bf16.mxu1 %v1152_v0 }
 0x42c   :  { %v440_v42 = vpop.f32.mrb[4].mxu1 }
 0x42d   :  { %v441_v43 = vadd.f32 %v749_v41, %v440_v42  ;;  %v820_v44 = vpop.f32.mrb[5].mxu1 }
 0x42e   :  { %v443_v45 = vpop.f32.mrb[6].mxu1 }
 0x42f   :  { %v446_v46 = vmax.f32 %v441_v43, 0.0  ;;  %v821_v47 = vpop.f32.mrb[7].mxu1 }
 0x431   :  { %v447_v48 = vpack.c.bf16 %v446_v46, %v446_v46 }
 0x433   :  { %827 = vmatmul.mubr.msk.bf16.vlgmr.msra.gmra.mrb[8].mxu0 %vm266_vm4, %v447_v48 }
 0x434   :  { %842 = vmatprep.mubr.msk.bf16.mxu0 %vm1154_vm2, %v1152_v0  ;;  %839 = vmatpush3.bf16.msra.mxu0 %v880_v50 }
 0x435   :  { %840 = vmatprep.subr.bf16.mxu0 %v1152_v0 }
 0x438   :  { %841 = vmatpush3.bf16.msra.mxu0 %v881_v59 }
 0x506   :  { %v508_v52 = vpop.f32.mrb[8].mxu0 }
 0x507   :  { %v509_v53 = vadd.f32 %v753_v51, %v508_v52  ;;  %v828_v54 = vpop.f32.mrb[9].mxu0 }
 0x508   :  { %v511_v55 = vpop.f32.mrb[10].mxu0 }
 0x509   :  { %v514_v56 = vmax.f32 %v509_v53, 0.0  ;;  %v829_v57 = vpop.f32.mrb[11].mxu0 }
 0x50b   :  { %v515_v58 = vpack.c.bf16 %v514_v56, %v514_v56 }
 0x50d   :  { %835 = vmatmul.mubr.msk.bf16.vlgmr.msra.gmra.mrb[8].mxu1 %vm266_vm4, %v515_v58 }
 0x50e   :  { %850 = vmatprep.mubr.msk.bf16.mxu1 %vm1154_vm2, %v1152_v0  ;;  %847 = vmatpush3.bf16.msra.mxu1 %v882_v60 }
 0x50f   :  { %848 = vmatprep.subr.bf16.mxu1 %v1152_v0 }
 0x512   :  { %849 = vmatpush3.bf16.msra.mxu1 %v883_v6 }
 0x5e0   :  { %v576_v62 = vpop.f32.mrb[8].mxu1 }
 0x5e1   :  { %v577_v63 = vadd.f32 %v757_v61, %v576_v62  ;;  %v836_v1 = vpop.f32.mrb[9].mxu1 }
 0x5e2   :  { %v579_v2 = vpop.f32.mrb[10].mxu1 }
 0x5e3   :  { %v582_v3 = vmax.f32 %v577_v63, 0.0  ;;  %v837_v4 = vpop.f32.mrb[11].mxu1 }
 0x5e5   :  { %v583_v5 = vpack.c.bf16 %v582_v3, %v582_v3 }
 0x5e7   :  { %843 = vmatmul.mubr.msk.bf16.vlgmr.msra.gmra.mrb[12].mxu0 %vm266_vm4, %v583_v5 }
 0x6ba   :  { %v644_v8 = vpop.f32.mrb[12].mxu0 }
 0x6bb   :  { %v645_v9 = vadd.f32 %v761_v7, %v644_v8  ;;  %v844_v10 = vpop.f32.mrb[13].mxu0 }
 0x6bc   :  { %v647_v0 = vpop.f32.mrb[14].mxu0 }
 0x6bd   :  { %v650_v11 = vmax.f32 %v645_v9, 0.0  ;;  %v845_v12 = vpop.f32.mrb[15].mxu0 }
 0x6bf   :  { %v651_v13 = vpack.c.bf16 %v650_v11, %v650_v11 }
 0x6c1   :  { %851 = vmatmul.mubr.msk.bf16.vlgmr.msra.gmra.mrb[12].mxu1 %vm266_vm4, %v651_v13 }
 0x794   :  { %v712_v15 = vpop.f32.mrb[12].mxu1 }
 0x795   :  { %v713_v16 = vadd.f32 %v765_v14, %v712_v15  ;;  %v852_v17 = vpop.f32.mrb[13].mxu1 }
 0x796   :  { %v715_v18 = vpop.f32.mrb[14].mxu1 }
 0x797   :  { %718 = vst [vmem:[#allocation19] sm:$0xff] %v713_v16  ;;  %v853_v19 = vpop.f32.mrb[15].mxu1 }
 0x798   :  { %1115 = shalt.err (!%p1112_p0)
}
 0x799   :  { %s1116_s16 = scalar_lea.hbm %s1490_s17, 128 }
 0x79a   :  { %p1117_p1 = scmp.ne.s32.totalorder %s1490_s17, %s1116_s16  ;;  %p1120_p2 = scmp.lt.u32.totalorder %s1116_s16, %s1490_s17 }
 0x79c   :  { %p1122_p3 = pnand %p1120_p2, %p1117_p1 }
 0x79e   :  { %1125 = shalt.err (!%p1122_p3)
}
 0x79f   :  { %728 = dma.vmem_to_hbm [thread:$0]  %s726_s25, 128, %s1490_s17, [#allocation4]  }
 0x7a0   :  { %1138 = dma.done.wait [#allocation4], 128  }
 0x7a1   :  { %1139 = vsyncadd [#allocation4], 4294967168 }
 0x7a2   :  { %732 = vsyncpa [#allocation3], 1 }
 0x7a3   :  { %733 = vsyncpa [#allocation6], 1 }
 0x7a4   :  { %734 = vsyncpa [#allocation9], 1 }
 0x7a5   :  { %735 = vsyncpa [#allocation12], 1 }
 0x7a6   :  { %736 = vsyncpa [#allocation15], 1 }
 0x7a7   :  { %737 = vsyncpa [#allocation18], 1 }
 0x7a8   :  { %738 = vsyncpa [#allocation4], 1 }

</bundles_post_ra>
